<compile_context>
chip_gen: v5e
topology: v5e:2x2
jax: 0.10.0
libtpu: 0.0.40
codegen_flags: <defaults>
</compile_context>

<pallas_src>
import functools

import jax
import jax.numpy as jnp
from jax.experimental import pallas as pl
from jax.experimental.pallas import tpu as pltpu


_NEG_INF = -1e30


def _round_up(x, m):
    return (x + m - 1) // m * m


def _cdiv(a, b):
    return (a + b - 1) // b


def _tpu_generation():
    """Best-effort TPU generation sniff: 'v5' | 'v6' | 'v7' | None."""
    try:
        kind = jax.devices()[0].device_kind.lower()
    except Exception:
        return None
    for g in ("v7", "v6", "v5"):
        if g in kind:
            return g
    return None


# ---------------------------------------------------------------------------
# Kernels
# ---------------------------------------------------------------------------

def _single_block_kernel(q_ref, k_ref, v_ref, bias_ref, o_ref, *,
                         scale, need_kv_mask):
    """One grid step per batch element: exact softmax, no flash machinery."""
    q = q_ref[...]
    if scale:                          # matches torch's `if scale:` truthiness
        q = q * scale                  # fold scale into q (small, bf16)

    s = jax.lax.dot_general(           # (Lq_p, Lk_p) f32 on the MXU
        q, k_ref[...],
        dimension_numbers=(((1,), (1,)), ((), ())),
        preferred_element_type=jnp.float32)
    if need_kv_mask:
        s = s + bias_ref[...]          # 0 for valid keys, -1e30 for padded keys

    m = jnp.max(s, axis=-1, keepdims=True)
    p = jnp.exp(s - m)
    l = jnp.sum(p, axis=-1, keepdims=True)

    ctx = jax.lax.dot_general(
        p.astype(v_ref.dtype), v_ref[...],
        dimension_numbers=(((1,), (0,)), ((), ())),
        preferred_element_type=jnp.float32)
    o_ref[...] = (ctx * pl.reciprocal(l, approx=True)).astype(o_ref.dtype)


def _flash_kernel(q_ref, k_ref, v_ref, bias_ref, o_ref,
                  m_scr, l_scr, acc_scr, *,
                  scale, need_kv_mask, exp_dtype):
    """Online-softmax (flash) step over one (q-tile, kv-tile) pair."""
    kv = pl.program_id(2)

    @pl.when(kv == 0)
    def _init():
        m_scr[...] = jnp.full_like(m_scr, _NEG_INF)
        l_scr[...] = jnp.zeros_like(l_scr)
        acc_scr[...] = jnp.zeros_like(acc_scr)

    q = q_ref[...]
    if scale:                          # matches torch's `if scale:` truthiness
        q = q * scale                  # fold scale into q (lq_t x D bf16), not s

    s = jax.lax.dot_general(           # (lq_t, lk_t) f32, MXU with f32 accumulate
        q, k_ref[...],
        dimension_numbers=(((1,), (1,)), ((), ())),
        preferred_element_type=jnp.float32)
    if need_kv_mask:
        # Additive key-padding bias (0 valid / -1e30 pad); single VPU pass.
        # Invariant: every kv tile contains >= 1 valid column, since
        # Lk_p = round_up(Lk, lk_t) never creates a fully-padded tile, so a
        # fully-masked tile can never poison l/acc.
        s = s + bias_ref[...]

    m_prev = m_scr[...]
    m_new = jnp.maximum(m_prev, jnp.max(s, axis=-1, keepdims=True))
    alpha = jnp.exp(m_prev - m_new)
    # exp in bf16 on v6e/v7x (halves EUP work, drops one full-tile cast);
    # f32 on v5e / unknown chips (v5e has no bf16 EUP/VPU path).
    p = jnp.exp((s - m_new).astype(exp_dtype))

    l_scr[...] = alpha * l_scr[...] + jnp.sum(
        p, axis=-1, keepdims=True, dtype=jnp.float32)
    acc_scr[...] = alpha * acc_scr[...] + jax.lax.dot_general(
        p.astype(v_ref.dtype), v_ref[...],
        dimension_numbers=(((1,), (0,)), ((), ())),
        preferred_element_type=jnp.float32)
    m_scr[...] = m_new

    # TODO(synk): nn.Dropout(0.1) is identity in eval mode; training-mode
    # dropout (pltpu.prng_random_bits masking of p) intentionally not applied.

    @pl.when(kv == pl.num_programs(2) - 1)
    def _finalize():
        inv_l = pl.reciprocal(l_scr[...], approx=True)   # EUP vrcp slot, ~free
        o_ref[...] = (acc_scr[...] * inv_l).astype(o_ref.dtype)


# ---------------------------------------------------------------------------
# Wrapper
# ---------------------------------------------------------------------------

def multimodal_attention(q, k, v, scale=None, attn_mask=None, *,
                         q_tile=None, kv_tile=None):
    """softmax(q @ k^T [* scale]) @ v batched over dim 0.

    Matches MultimodalAttention.forward in eval mode with attn_mask=None.
    """
    # TODO(synk): attn_mask (masked_fill with -inf) not wired; the module's
    # default call path passes attn_mask=None.
    assert attn_mask is None, "attn_mask is not supported"

    B, Lq, D = q.shape
    Bk, Lk, Dk = k.shape
    Bv, Lkv, Dv = v.shape
    assert Bk == B and Bv == B and Dk == D and Lkv == Lk

    out_dtype = q.dtype
    compute_dtype = (jnp.bfloat16 if jnp.issubdtype(q.dtype, jnp.floating)
                     else q.dtype)

    # Per-generation tuning: (q_tile, kv_tile, scoped-VMEM limit, exp dtype).
    gen = _tpu_generation()
    if gen == "v5":          # 128^2 MXUs, 128 MiB VMEM, no bf16 EUP/VPU
        q_t_d, kv_t_d, vmem_limit, exp_dtype = 256, 512, 64 << 20, jnp.float32
    elif gen == "v6":        # 256^2 MXUs, 128 MiB VMEM
        q_t_d, kv_t_d, vmem_limit, exp_dtype = 512, 512, 64 << 20, jnp.bfloat16
    elif gen == "v7":        # 256^2 MXUs, 64 MiB VMEM, 2 TCs/chip
        q_t_d, kv_t_d, vmem_limit, exp_dtype = 512, 512, 48 << 20, jnp.bfloat16
    else:                    # unknown: conservative, known-good settings
        q_t_d, kv_t_d, vmem_limit, exp_dtype = 256, 512, 32 << 20, jnp.float32
    q_tile = q_t_d if q_tile is None else _round_up(q_tile, 128)
    kv_tile = kv_t_d if kv_tile is None else _round_up(kv_tile, 128)

    # Sequence tiles: multiples of 16 (bf16 sublane packing), capped by the
    # padded problem size so small inputs run as one tile per batch element.
    lq_t = min(q_tile, _round_up(Lq, 16))
    lk_t = min(kv_tile, _round_up(Lk, 16))

    if gen == "v7":
        # 2 TensorCores/chip: keep >= 2 blocks of work on the parallel axes.
        while lq_t > 128 and B * _cdiv(Lq, lq_t) < 2:
            lq_t //= 2

    Lq_p = _round_up(Lq, lq_t)
    Lk_p = _round_up(Lk, lk_t)
    # D (contraction dim) is never padded; Dv is padded to a multiple of 128
    # only when needed so the output store is lane-dense (unmasked vst).
    Dv_p = Dv if Dv % 128 == 0 else _round_up(Dv, 128)

    def prep(x, seq_p, feat_p):
        _, s_, f_ = x.shape
        x = x.astype(compute_dtype)          # single wrapper-side cast
        if s_ != seq_p or f_ != feat_p:
            x = jnp.pad(x, ((0, 0), (0, seq_p - s_), (0, feat_p - f_)))
        return x

    qp = prep(q, Lq_p, D)
    kp = prep(k, Lk_p, D)
    vp = prep(v, Lk_p, Dv_p)

    need_kv_mask = Lk_p != Lk
    # Precomputed additive key-padding bias: 0 valid, -1e30 padded.
    bias = jnp.where(jnp.arange(Lk_p) < Lk, 0.0, _NEG_INF
                     ).astype(jnp.float32).reshape(1, Lk_p)

    n_q, n_k = Lq_p // lq_t, Lk_p // lk_t

    if n_q == 1 and n_k == 1:
        # Tiny-shape regime: one grid step per batch element, exact softmax.
        kernel = functools.partial(_single_block_kernel, scale=scale,
                                   need_kv_mask=need_kv_mask)
        out_p = pl.pallas_call(
            kernel,
            out_shape=jax.ShapeDtypeStruct((B, Lq_p, Dv_p), out_dtype),
            grid_spec=pltpu.PrefetchScalarGridSpec(
                num_scalar_prefetch=0,
                grid=(B,),
                in_specs=[
                    pl.BlockSpec((pl.Squeezed(), Lq_p, D), lambda b: (b, 0, 0)),
                    pl.BlockSpec((pl.Squeezed(), Lk_p, D), lambda b: (b, 0, 0)),
                    pl.BlockSpec((pl.Squeezed(), Lk_p, Dv_p), lambda b: (b, 0, 0)),
                    pl.BlockSpec((1, Lk_p), lambda b: (0, 0)),
                ],
                out_specs=pl.BlockSpec((pl.Squeezed(), Lq_p, Dv_p),
                                       lambda b: (b, 0, 0)),
            ),
            compiler_params=pltpu.CompilerParams(
                dimension_semantics=("parallel",),
                vmem_limit_bytes=vmem_limit,
            ),
        )(qp, kp, vp, bias)
    else:
        kernel = functools.partial(_flash_kernel, scale=scale,
                                   need_kv_mask=need_kv_mask,
                                   exp_dtype=exp_dtype)
        out_p = pl.pallas_call(
            kernel,
            out_shape=jax.ShapeDtypeStruct((B, Lq_p, Dv_p), out_dtype),
            grid_spec=pltpu.PrefetchScalarGridSpec(
                num_scalar_prefetch=0,
                grid=(B, n_q, n_k),
                in_specs=[
                    pl.BlockSpec((pl.Squeezed(), lq_t, D),
                                 lambda b, qi, ki: (b, qi, 0)),
                    # NOTE: pipeline_mode=pl.Buffered(3) on K/V is a further
                    # tuning knob if DMA is still exposed after tile growth.
                    pl.BlockSpec((pl.Squeezed(), lk_t, D),
                                 lambda b, qi, ki: (b, ki, 0)),
                    pl.BlockSpec((pl.Squeezed(), lk_t, Dv_p),
                                 lambda b, qi, ki: (b, ki, 0)),
                    pl.BlockSpec((1, lk_t), lambda b, qi, ki: (0, ki)),
                ],
                out_specs=pl.BlockSpec((pl.Squeezed(), lq_t, Dv_p),
                                       lambda b, qi, ki: (b, qi, 0)),
                scratch_shapes=[
                    pltpu.VMEM((lq_t, 1), jnp.float32),      # running max m
                    pltpu.VMEM((lq_t, 1), jnp.float32),      # running denom l
                    pltpu.VMEM((lq_t, Dv_p), jnp.float32),   # output accumulator
                ],
            ),
            compiler_params=pltpu.CompilerParams(
                # batch & query-tile axes shard across TensorCores (v7x
                # megacore); the kv axis carries the online-softmax state.
                dimension_semantics=("parallel", "parallel", "arbitrary"),
                vmem_limit_bytes=vmem_limit,
            ),
        )(qp, kp, vp, bias)

    if Lq_p != Lq or Dv_p != Dv:
        out_p = out_p[:, :Lq, :Dv]
    return out_p


# ---------------------------------------------------------------------------
# Reference + test
# ---------------------------------------------------------------------------

def _reference(q, k, v, scale=None):
    # Precision-matched reference (bf16-operand / f32-accumulate matmuls);
    # semantics identical to the PyTorch module in eval mode, attn_mask=None.
    s = jnp.einsum("bqd,bkd->bqk", q.astype(jnp.bfloat16),
                   k.astype(jnp.bfloat16),
                   preferred_element_type=jnp.float32)
    if scale:
        s = s * scale
    attn = jax.nn.softmax(s, axis=-1)
    ctx = jnp.einsum("bqk,bkd->bqd", attn.astype(jnp.bfloat16),
                     v.astype(jnp.bfloat16),
                     preferred_element_type=jnp.float32)
    return ctx.astype(q.dtype)


if __name__ == "__main__":
    key = jax.random.PRNGKey(0)
    kq, kk, kv_, kq2, kk2, kv2 = jax.random.split(key, 6)

    # Small shapes ("feature vector as a sequence") -> single-block path.
    B, Lq, Lk, D, Dv = 2, 8, 8, 32, 32
    q = jax.random.normal(kq, (B, Lq, D), dtype=jnp.float32)
    k = jax.random.normal(kk, (B, Lk, D), dtype=jnp.float32)
    v = jax.random.normal(kv_, (B, Lk, Dv), dtype=jnp.float32)

    out = jax.block_until_ready(multimodal_attention(q, k, v))
    assert out.shape == (B, Lq, Dv)
    ref = _reference(q, k, v)
    assert jnp.allclose(out, ref, atol=2e-2, rtol=2e-2), "small-path mismatch"

    # Larger shapes exercising the flash path (multiple kv tiles, key-padding
    # mask, Dv padding, scale).
    B2, Lq2, Lk2, D2, Dv2 = 2, 300, 600, 64, 80
    q2 = jax.random.normal(kq2, (B2, Lq2, D2), dtype=jnp.float32)
    k2 = jax.random.normal(kk2, (B2, Lk2, D2), dtype=jnp.float32)
    v2 = jax.random.normal(kv2, (B2, Lk2, Dv2), dtype=jnp.float32)
    scale2 = 1.0 / (D2 ** 0.5)

    out2 = jax.block_until_ready(multimodal_attention(q2, k2, v2, scale2))
    assert out2.shape == (B2, Lq2, Dv2)
    ref2 = _reference(q2, k2, v2, scale2)
    assert jnp.allclose(out2, ref2, atol=3e-2, rtol=3e-2), "flash-path mismatch"

    print("KERNEL_OK")
</pallas_src>

<mosaic_0001>
module attributes {stable_mosaic.version = 11 : i64} {
  func.func @_single_block_kernel(%arg0: i32, %arg1: memref<1x16x32xbf16, #tpu.memory_space<vmem>>, %arg2: memref<1x16x32xbf16, #tpu.memory_space<vmem>>, %arg3: memref<1x16x128xbf16, #tpu.memory_space<vmem>>, %arg4: memref<1x16xf32, #tpu.memory_space<vmem>>, %arg5: memref<1x16x128xf32, #tpu.memory_space<vmem>>) attributes {dimension_semantics = [#tpu.dimension_semantics<parallel>], iteration_bounds = array<i64: 2>, scalar_prefetch = 0 : i64, scratch_operands = 0 : i64, tpu.core_type = #tpu.core_type<tc>, window_params = [{transform_indices = @transform_0, window_bounds = array<i64: 1, 16, 32>}, {transform_indices = @transform_1, window_bounds = array<i64: 1, 16, 32>}, {transform_indices = @transform_2, window_bounds = array<i64: 1, 16, 128>}, {pipeline_mode = #tpu.pipeline_mode<synchronous>, transform_indices = @transform_3, window_bounds = array<i64: 1, 16>}, {transform_indices = @transform_4, window_bounds = array<i64: 1, 16, 128>}]} {
    %c0 = arith.constant 0 : index
    %c0_0 = arith.constant 0 : index
    %c0_1 = arith.constant 0 : index
    %0 = vector.load %arg1[%c0, %c0_0, %c0_1] : memref<1x16x32xbf16, #tpu.memory_space<vmem>>, vector<1x16x32xbf16>
    %1 = vector.shape_cast %0 : vector<1x16x32xbf16> to vector<16x32xbf16>
    %c0_2 = arith.constant 0 : index
    %c0_3 = arith.constant 0 : index
    %c0_4 = arith.constant 0 : index
    %2 = vector.load %arg2[%c0_2, %c0_3, %c0_4] : memref<1x16x32xbf16, #tpu.memory_space<vmem>>, vector<1x16x32xbf16>
    %3 = vector.shape_cast %2 : vector<1x16x32xbf16> to vector<16x32xbf16>
    %cst = arith.constant dense<0.000000e+00> : vector<16x16xf32>
    %4 = tpu.matmul %1, %3, %cst {dimension_numbers = #tpu.dot_dimension_numbers<[1], [1], [0], [0], [0, 0, 1, 0], [], []>} : vector<16x32xbf16>, vector<16x32xbf16>, vector<16x16xf32> -> vector<16x16xf32>
    %c0_5 = arith.constant 0 : index
    %c0_6 = arith.constant 0 : index
    %5 = vector.load %arg4[%c0_5, %c0_6] : memref<1x16xf32, #tpu.memory_space<vmem>>, vector<1x16xf32>
    %6 = vector.broadcast %5 : vector<1x16xf32> to vector<16x16xf32>
    %7 = arith.addf %4, %6 : vector<16x16xf32>
    %cst_7 = arith.constant dense<0xFF800000> : vector<16xf32>
    %8 = vector.multi_reduction <maximumf>, %7, %cst_7 [1] : vector<16x16xf32> to vector<16xf32>
    %9 = vector.shape_cast %8 : vector<16xf32> to vector<16x1xf32>
    %10 = vector.broadcast %9 : vector<16x1xf32> to vector<16x16xf32>
    %11 = arith.subf %7, %10 : vector<16x16xf32>
    %12 = math.exp %11 : vector<16x16xf32>
    %cst_8 = arith.constant dense<0.000000e+00> : vector<16xf32>
    %13 = vector.multi_reduction <add>, %12, %cst_8 [1] : vector<16x16xf32> to vector<16xf32>
    %14 = vector.shape_cast %13 : vector<16xf32> to vector<16x1xf32>
    %15 = arith.truncf %12 : vector<16x16xf32> to vector<16x16xbf16>
    %c0_9 = arith.constant 0 : index
    %c0_10 = arith.constant 0 : index
    %c0_11 = arith.constant 0 : index
    %16 = vector.load %arg3[%c0_9, %c0_10, %c0_11] : memref<1x16x128xbf16, #tpu.memory_space<vmem>>, vector<1x16x128xbf16>
    %17 = vector.shape_cast %16 : vector<1x16x128xbf16> to vector<16x128xbf16>
    %cst_12 = arith.constant dense<0.000000e+00> : vector<16x128xf32>
    %18 = tpu.matmul %15, %17, %cst_12 {dimension_numbers = #tpu.dot_dimension_numbers<[1], [0], [0], [1], [0, 0, 1, 1], [], []>} : vector<16x16xbf16>, vector<16x128xbf16>, vector<16x128xf32> -> vector<16x128xf32>
    %19 = tpu.reciprocal %14 {approx = true} : vector<16x1xf32> -> vector<16x1xf32>
    %20 = vector.broadcast %19 : vector<16x1xf32> to vector<16x128xf32>
    %21 = arith.mulf %18, %20 : vector<16x128xf32>
    %c0_13 = arith.constant 0 : index
    %c0_14 = arith.constant 0 : index
    %c0_15 = arith.constant 0 : index
    %22 = vector.load %arg5[%c0_13, %c0_14, %c0_15] : memref<1x16x128xf32, #tpu.memory_space<vmem>>, vector<1x16x128xf32>
    %23 = vector.shape_cast %22 : vector<1x16x128xf32> to vector<16x128xf32>
    %24 = vector.shape_cast %21 : vector<16x128xf32> to vector<1x16x128xf32>
    tpu.vector_store %arg5[%c0_13, %c0_14, %c0_15], %24 {strides = array<i32>} : memref<1x16x128xf32, #tpu.memory_space<vmem>>, vector<1x16x128xf32>,
    return
  }
  func.func @transform_0(%arg0: i32) -> (i32, i32, i32) {
    %c0_i32 = arith.constant 0 : i32
    %c0_i32_0 = arith.constant 0 : i32
    %c0_i32_1 = arith.constant 0 : i32
    return %arg0, %c0_i32, %c0_i32_0 : i32, i32, i32
  }
  func.func @transform_1(%arg0: i32) -> (i32, i32, i32) {
    %c0_i32 = arith.constant 0 : i32
    %c0_i32_0 = arith.constant 0 : i32
    %c0_i32_1 = arith.constant 0 : i32
    return %arg0, %c0_i32, %c0_i32_0 : i32, i32, i32
  }
  func.func @transform_2(%arg0: i32) -> (i32, i32, i32) {
    %c0_i32 = arith.constant 0 : i32
    %c0_i32_0 = arith.constant 0 : i32
    %c0_i32_1 = arith.constant 0 : i32
    return %arg0, %c0_i32, %c0_i32_0 : i32, i32, i32
  }
  func.func @transform_3(%arg0: i32) -> (i32, i32) {
    %c0_i32 = arith.constant 0 : i32
    %c0_i32_0 = arith.constant 0 : i32
    %c0_i32_1 = arith.constant 0 : i32
    return %c0_i32, %c0_i32_0 : i32, i32
  }
  func.func @transform_4(%arg0: i32) -> (i32, i32, i32) {
    %c0_i32 = arith.constant 0 : i32
    %c0_i32_0 = arith.constant 0 : i32
    %c0_i32_1 = arith.constant 0 : i32
    return %arg0, %c0_i32, %c0_i32_0 : i32, i32, i32
  }
}

</mosaic_0001>

<bundles_post_ra>
// kernel: tpu_custom_call.1
= control target key start
LH: loop header
LB: loop body
LE: loop exit
PB: predicated region body
PF: predicated region fallthrough
CT: control target
= control target key end

     0   :  { %s1023_s0 = inlined_call_operand.hbm [shape: bf16[2,16,32], index: 0, kind: input, shape index: {}]   ;;  %s1024_s1 = inlined_call_operand.hbm [shape: bf16[2,16,32], index: 1, kind: input, shape index: {}]   ;;  %s1025_s2 = inlined_call_operand.hbm [shape: bf16[2,16,128], index: 2, kind: input, shape index: {}]   ;;  %s1026_s3 = inlined_call_operand.vmem [shape: f32[1,16], index: 3, kind: input, shape index: {}]   ;;  %s1027_s4 = inlined_call_operand.hbm [shape: f32[2,16,128], index: 4, kind: output, shape index: {}]  }
   0x1   :  { %1031 = sst [smem:[#allocation14_spill]] %s1023_s0 }
   0x2   :  { %1032 = sst [smem:[#allocation15_spill]] %s1024_s1 }
   0x3   :  { %9 = vsyncpa [#allocation3], 0 }
   0x4   :  { %11 = vsyncpa [#allocation3 + $0x1], 0 }
   0x5   :  { %12 = vsyncpa [#allocation6], 0 }
   0x6   :  { %14 = vsyncpa [#allocation6 + $0x1], 0 }
   0x7   :  { %15 = vsyncpa [#allocation4], 0 }
   0x8   :  { %17 = vsyncpa [#allocation4 + $0x1], 0  ;;  %s825_s15 = smov 0   ;;  %s827_s16 = smov 0  }
   0x9   :  { %s829_s17 = smov 0   ;;  %s831_s18 = smov 0  }
   0xa LB: > { %1033 = sst [smem:[#allocation12_spill]] %s790_s17  ;;  %s846_s19 = sadd.s32 4294967295, %s794_s18   ;;  %s794_s18 = sphi %s831_s18, %s1047_s18   ;;  %s790_s17 = sphi %s829_s17, %s1044_s17   ;;  %s786_s16 = sphi %s827_s16, %s1046_s16   ;;  %s782_s15 = sphi %s825_s15, %s1045_s15  }
   0xb   : > { %s522_s20 = sadd.s32 4294967294, %s794_s18   ;;  %s850_s21 = sadd.s32 1, %s794_s18  }
   0xc   : > { %s30_s22 = sadd.s32 1, %s790_s17  ;;  %s27_s23 = ssub.s32 %s794_s18, %s850_s21 }
   0xd   : > { %p37_p0 = scmp.ne.s32.totalorder %s790_s17, %s786_s16  ;;  %p28_p1 = scmp.eq.s32.totalorder %s27_s23, 0 }
   0xe   : > { %p38_p2 = scmp.eq.s32.totalorder %s794_s18, 0  ;;  %p43_p3 = scmp.ne.s32.totalorder %s786_s16, %s782_s15 }
   0xf   : > { %p44_p4 = scmp.eq.s32.totalorder %s846_s19, 0  ;;  %p140_p7 = scmp.eq.s32.totalorder %s846_s19, 1 }
  0x10   : > { %s862_s24 = scalar_select %p28_p1, %s790_s17, %s30_s22  }
  0x11   : > { %p39_p5 = por %p38_p2, %p37_p0  ;;  %p864_p6 = por %p44_p4, %p43_p3 }
  0x12   : > { %1034 = sst [smem:[#allocation13_spill]] %s862_s24  ;;  %p146_p8 = scmp.eq.s32.totalorder %s522_s20, 1 }
  0x13   : > { %p524_p9 = scmp.ge.s32.totalorder %s794_s18, 2  ;;  %p587_p10 = scmp.lt.s32.totalorder %s794_s18, 2 }
  0x14   : > { %p871_p11 = por %p140_p7, %p37_p0  ;;  %p875_p12 = por %p146_p8, %p43_p3 }
  0x15   : > { %s169_s28 = sand.u32 1, %s790_s17   ;;  %s881_s29 = sshll.u32 %s794_s18, 3 }
  0x16   : > { %s885_s30 = sshll.u32 %s169_s28, 3  ;;  %p887_p13 = pnand %p587_p10, %p39_p5 }
  0x17   : > { %s191_s6 = sand.u32 1, %s794_s18   ;;  %s1039_s1 = sld [smem:[#allocation15_spill]] }
  0x18   : > { %s195_s10 = scalar_lea.vmem [#allocation5], %s885_s30  ;;  %p534_p0 = scmp.ge.s32.totalorder %s794_s18, 1 }
  0x19   : > { %s203_s11 = sshll.u32 %s195_s10, 4  ;;  %s898_s13 = scalar_lea.sflag [#allocation6], %s191_s6  ;;  %s204_s11 = int_to_ptr.vmem [resolvable:$true] %s203_s11 }
  0x1a   : > { %p638_p2 = pneg %p887_p13 }
  0x1d   : > { %s200_s9 = scalar_lea.hbm %s1039_s1, %s881_s29  ;;  %s641_s7 = scalar_lea.hbm %s1039_s1, 16 }
  0x1e   : > { %s201_s12 = sshll.u32 %s200_s9, 4  ;;  %s202_s12 = int_to_ptr.hbm [resolvable:$true] %s201_s12 }
  0x1f   : > { %s634_s14 = sshra.s32 %s202_s12, 4  ;;  %s635_s14 = int_to_ptr.hbm [resolvable:$true] %s634_s14 }
  0x20   : > { %s636_s20 = scalar_lea.hbm %s635_s14, 8  ;;  %p642_p5 = scmp.lt.s32.totalorder %s635_s14, %s1039_s1 }
  0x21   : > { %p637_p1 = scmp.ne.s32.totalorder %s635_s14, %s636_s20  ;;  %p643_p7 = scmp.lt.s32.totalorder %s641_s7, %s636_s20 }
  0x23   : > { %p639_p3 = pnand %p638_p2, %p637_p1  ;;  %p644_p8 = por %p643_p7, %p642_p5 }
  0x25   : > { %p640_p4 = pneg %p639_p3 }
  0x27   : > { %p645_p10 = pnand %p644_p8, %p640_p4 }
  0x29   : > { %648 = shalt.err (!%p645_p10)
}
  0x2a   : > { %s1028_s6 = smov 64   ;;  %s797_s10 = smov 4  }
  0x2b   : > { %579 = dma.hbm_to_vmem [thread:$0]  (!%p887_p13), %s202_s12, 128, %s204_s11, %s898_s13, %s1028_s6, %s1028_s6, %s797_s10  }
  0x2c   : > { %p233_p1 = scmp.lt.s32.totalorder %s794_s18, 3  ;;  %s1040_s0 = sld [smem:[#allocation14_spill]] }
  0x2d   : > { %s173_s8 = scalar_lea.vmem [#allocation2], %s885_s30  ;;  %s170_s1 = scalar_lea.sflag [#allocation3], %s169_s28 }
  0x2e   : > { %p924_p3 = pnand %p534_p0, %p233_p1  ;;  %s181_s9 = sshll.u32 %s173_s8, 4  ;;  %s182_s9 = int_to_ptr.vmem [resolvable:$true] %s181_s9 }
  0x32   : > { %s178_s22 = scalar_lea.hbm %s1040_s0, %s881_s29  ;;  %s671_s20 = scalar_lea.hbm %s1040_s0, 16 }
  0x33   : > { %s179_s7 = sshll.u32 %s178_s22, 4  ;;  %s180_s7 = int_to_ptr.hbm [resolvable:$true] %s179_s7 }
  0x34   : > { %s664_s24 = sshra.s32 %s180_s7, 4  ;;  %s665_s24 = int_to_ptr.hbm [resolvable:$true] %s664_s24 }
  0x35   : > { %s666_s11 = scalar_lea.hbm %s665_s24, 8  ;;  %p672_p0 = scmp.lt.s32.totalorder %s665_s24, %s1040_s0 }
  0x36   : > { %p667_p4 = scmp.ne.s32.totalorder %s665_s24, %s666_s11  ;;  %p673_p8 = scmp.lt.s32.totalorder %s671_s20, %s666_s11 }
  0x38   : > { %p669_p5 = pnand %p667_p4, %p638_p2  ;;  %p674_p10 = por %p673_p8, %p672_p0 }
  0x3a   : > { %p670_p7 = pneg %p669_p5 }
  0x3c   : > { %p675_p1 = pnand %p674_p10, %p670_p7 }
  0x3e   : > { %678 = shalt.err (!%p675_p1)
}
  0x3f   : > { %s1042_s28 = smov 64   ;;  %s222_s14 = scalar_lea.hbm %s1025_s2, %s881_s29 }
  0x40   : > { %576 = dma.hbm_to_vmem [thread:$0]  (!%p887_p13), %s180_s7, 128, %s182_s9, %s170_s1, %s1042_s28, %s1042_s28, %s797_s10  }
  0x41   : > { %s217_s17 = scalar_lea.vmem [#allocation7], %s885_s30  ;;  %s223_s24 = sshll.u32 %s222_s14, 4  ;;  %s224_s24 = int_to_ptr.hbm [resolvable:$true] %s223_s24 }
  0x42   : > { %s225_s6 = sshll.u32 %s217_s17, 4  ;;  %s694_s11 = sshra.s32 %s224_s24, 4  ;;  %s226_s6 = int_to_ptr.vmem [resolvable:$true] %s225_s6  ;;  %s695_s11 = int_to_ptr.hbm [resolvable:$true] %s694_s11 }
  0x43   : > { %s696_s20 = scalar_lea.hbm %s695_s11, 8  ;;  %s701_s1 = scalar_lea.hbm %s1025_s2, 16 }
  0x44   : > { %p697_p4 = scmp.ne.s32.totalorder %s695_s11, %s696_s20  ;;  %p702_p0 = scmp.lt.s32.totalorder %s695_s11, %s1025_s2 }
  0x45   : > { %p703_p8 = scmp.lt.s32.totalorder %s701_s1, %s696_s20 }
  0x46   : > { %p699_p5 = pnand %p697_p4, %p638_p2 }
  0x47   : > { %p704_p10 = por %p703_p8, %p702_p0 }
  0x48   : > { %p700_p7 = pneg %p699_p5 }
  0x4a   : > { %p705_p1 = pnand %p704_p10, %p700_p7 }
  0x4c   : > { %708 = shalt.err (!%p705_p1)
}
  0x4d   : > { %582 = dma.hbm_to_vmem [thread:$0]  (!%p887_p13), %s224_s24, 128, %s226_s6, %s898_s13, %s1042_s28, %s1042_s28, %s797_s10  }
  0x4e   : > { %237 = sbr.rel (%p924_p3) target bundleno = 502 (0x1f6), region = 36  ;;  %s968_s0 = sand.u32 (!%p924_p3), 1, %s786_s16  }
  0x4f   : > { %s535_s17 = sshll.u32 (!%p924_p3), %s968_s0, 3  ;;  %s240_s29 = scalar_lea.sflag (!%p924_p3), [#allocation3], %s968_s0 }
  0x50   : > { %s243_s30 = scalar_lea.vmem (!%p924_p3), [#allocation2], %s535_s17 }
  0x53   : > { %769 = dma.done.wait (%p864_p6), %s240_s29, 128  }
  0x54   : > { %771 = vsyncadd (%p864_p6), %s240_s29, 4294967168  ;;  %s249_s5 = sand.u32 1, %s846_s19   ;;  %s253_s10 = scalar_lea.vmem [#allocation5], %s535_s17 }
  0x55   : > { %s250_s13 = scalar_lea.sflag [#allocation6], %s249_s5 }
  0x56   : > { %773 = dma.done.wait (%p864_p6), %s250_s13, 256  }
  0x57   : > { %775 = vsyncadd (%p864_p6), %s250_s13, 4294967040  ;;  %vm318_vm0 = vcmask 261120   ;;  %v562_v0 = vld [vmem:[%s253_s10] sm:$0xff]  ;;  %v561_v2 = vld [vmem:[%s243_s30] sm:$0xff]  ;;  %vm339_vm1 = vcmask 130048   ;;  %s263_s25 = scalar_lea.vmem [#allocation7], %s535_s17 }
  0x58   : > { %v323_v1 = vsel %vm318_vm0, %v562_v0, 0  ;;  %v625_v3 = vld [vmem:[%s1026_s3] ss:$0 sm:$0xff]  ;;  %s538_s8 = sshll.u32 %s968_s0, 4  ;;  %s564_s12 = sshll.u32 %s846_s19, 4 }
  0x59   : > { %332 = vmatpush.bf16.xpose.msra.mxu0 %v323_v1  ;;  %v563_v10 = vld [vmem:[%s263_s25] sm:$0xff]  ;;  %s402_s24 = scalar_lea.hbm %s1027_s4, %s564_s12  ;;  %s298_s11 = scalar_lea.vmem [#allocation8], %s538_s8 }
  0x5a   : > { %377 = vmatpush.bf16.msra.mxu1 %v563_v10  ;;  %s403_s20 = sshll.u32 %s298_s11, 4  ;;  %s405_s22 = sshll.u32 %s402_s24, 4  ;;  %s404_s20 = int_to_ptr.vmem [resolvable:$true] %s403_s20  ;;  %s406_s22 = int_to_ptr.hbm [resolvable:$true] %s405_s22 }
  0x5b   : > { %s391_s19 = scalar_lea.sflag [#allocation4], %s968_s0  ;;  %s738_s1 = sshra.s32 %s406_s22, 4  ;;  %s739_s1 = int_to_ptr.hbm [resolvable:$true] %s738_s1 }
  0x5c   : > { %s740_s7 = scalar_lea.hbm %s739_s1, 16  ;;  %s744_s29 = scalar_lea.hbm %s1027_s4, 32 }
  0x5d   : > { %p741_p6 = scmp.ne.s32.totalorder %s739_s1, %s740_s7  ;;  %p745_p3 = scmp.lt.s32.totalorder %s739_s1, %s1027_s4 }
  0x5e   : > { %p746_p4 = scmp.lt.s32.totalorder %s744_s29, %s740_s7 }
  0x5f   : > { %p742_p13 = pnand %p741_p6, %p871_p11 }
  0x60   : > { %547 = vmatmul.msk.bf16.vlgmr.msra.gmra.mxu0 %vm318_vm0, %v561_v2  ;;  %p747_p5 = por %p746_p4, %p745_p3 }
  0x61   : > { %p743_p2 = pneg %p742_p13 }
  0x63   : > { %p748_p7 = pnand %p747_p5, %p743_p2 }
  0xdd   : > { %v334_v4 = vpop.f32.mrf.mxu0 }
  0xde   : > { %v335_v5 = vadd.f32 %v625_v3, %v334_v4 }
  0xe0   : > { %v340_v6 = vsel %vm339_vm1, %v335_v5, -inf }
  0xe1   : > { %341 = vmax.xlane.f32.xlu0 %v340_v6 }
  0xe5   : > { %v336_v7 = vpop.f32.mrf.mxu0 }
  0xe6   : > { %v337_v8 = vadd.f32 %v625_v3, %v336_v7 }
  0xe8   : > { %v343_v9 = vsel %vm339_vm1, %v337_v8, -inf }
  0xe9   : > { %344 = vmax.xlane.f32.xlu0 %v343_v9 }
 0x154   : > { %v342_v11 = vpop.xlane.xlu0 %341 }
 0x155   : > { %v346_v12 = vsub.f32 %v335_v5, %v342_v11 }
 0x157   : > { %v348_v13 = vmul.f32 1.442695, %v346_v12 }
 0x159   : > { %626 = vpow2.f32 %v348_v13 }
 0x15c   : > { %v345_v14 = vpop.xlane.xlu0 %344 }
 0x15d   : > { %v347_v15 = vsub.f32 %v337_v8, %v345_v14 }
 0x15f   : > { %v627_v16 = vpop.eup %626  ;;  %v350_v17 = vmul.f32 1.442695, %v347_v15 }
 0x160   : > { %v352_v18 = vsel %vm339_vm1, %v627_v16, 0.0 }
 0x161   : > { %628 = vpow2.f32 %v350_v17  ;;  %353 = vadd.xlane.f32.xlu1 %v352_v18 }
 0x167   : > { %v629_v19 = vpop.eup %628 }
 0x168   : > { %v355_v20 = vsel %vm339_vm1, %v629_v19, 0.0  ;;  %v358_v21 = vpack.c.bf16 %v629_v19, %v627_v16 }
 0x169   : > { %356 = vadd.xlane.f32.xlu1 %v355_v20 }
 0x16a   : > { %552 = vmatmul.msk.bf16.vlgmr.msra.gmra.mxu1 %vm339_vm1, %v358_v21 }
 0x1d4   : > { %v354_v22 = vpop.xlane.xlu1 %353 }
 0x1d5   : > { %630 = vrcp.f32 %v354_v22 }
 0x1db   : > { %v631_v24 = vpop.eup %630 }
 0x1dc   : > { %v357_v23 = vpop.xlane.xlu1 %356 }
 0x1dd   : > { %632 = vrcp.f32 %v357_v23 }
 0x1e3   : > { %v633_v27 = vpop.eup %632 }
 0x1e7   : > { %v379_v25 = vpop.f32.mrf.mxu1 }
 0x1e8   : > { %v386_v26 = vmul.f32 %v631_v24, %v379_v25 }
 0x1ea   : > { %388 = vst [vmem:[%s298_s11] sm:$0xff] %v386_v26 }
 0x1ef   : > { %v381_v28 = vpop.f32.mrf.mxu1 }
 0x1f0   : > { %v387_v29 = vmul.f32 %v633_v27, %v381_v28 }
 0x1f2   : > { %389 = vst [vmem:[%s298_s11 + $0x8] sm:$0xff] %v387_v29 }
 0x1f3   : > { %751 = shalt.err (!%p748_p7)
}
 0x1f4   : > { %s798_s0 = smov 128   ;;  %s799_s13 = smov 8  }
 0x1f5   : > { %571 = dma.vmem_to_hbm [thread:$0]  (%p871_p11), %s404_s20, 256, %s406_s22, %s391_s19, %s798_s0, %s798_s0, %s799_s13  }
 0x1f6 PF: > { %s420_s10 = sand.u32 1, %s782_s15   ;;  %p584_p0 = pnand %p524_p9, %p875_p12 }
 0x1f7   : > { %s421_s23 = scalar_lea.sflag [#allocation4], %s420_s10 }
 0x1f8   : > { %p585_p8 = pneg %p584_p0 }
 0x1fa   : > { %777 = dma.done.wait (%p585_p8), %s421_s23, 256  }
 0x1fb   : > { %779 = vsyncadd (%p585_p8), %s421_s23, 4294967040  ;;  %s1043_s28 = sld [smem:[#allocation12_spill]]  ;;  %p20_p10 = scmp.ge.s32.totalorder %s850_s21, 4  }
 0x1fc   : > { %s1044_s17 = sld [smem:[#allocation13_spill]]  ;;  %s1045_s15 = smov %s786_s16 }
 0x1fd   : > { %s1047_s18 = smov %s850_s21  ;;  %22 = sbr.rel (!%p20_p10) target bundleno = 10 (0xa), region = 105 }
 0x201   : > { %s1046_s16 = smov %s1043_s28 }
 0x202   :  { %427 = vsyncpa [#allocation3], 1 }
 0x203   :  { %429 = vsyncpa [#allocation3 + $0x1], 1 }
 0x204   :  { %430 = vsyncpa [#allocation6], 1 }
 0x205   :  { %432 = vsyncpa [#allocation6 + $0x1], 1 }
 0x206   :  { %433 = vsyncpa [#allocation4], 1 }
 0x207   :  { %435 = vsyncpa [#allocation4 + $0x1], 1 }

</bundles_post_ra>
